<compile_context>
chip_gen: v5e
topology: v5e:2x2
jax: 0.10.0
libtpu: 0.0.40
codegen_flags: <defaults>
</compile_context>

<pallas_src>
import numpy as np

import jax
import jax.numpy as jnp
from jax.experimental import pallas as pl
from jax.experimental.pallas import tpu as pltpu


# ---------------------------------------------------------------------------
# Pallas kernel: fused patch-embed GEMM + (bias + position embedding) epilogue
# ---------------------------------------------------------------------------
def _patch_embed_kernel(p_ref, w_ref, pe_ref, o_ref):
    # p:  (1, tP, K)   bf16 im2col patches for one (patch-tile, batch) step
    # w:  (K, Hd)      bf16 conv weight reshaped to (Cin*ph*pw, hidden); resident
    # pe: (tP, Hd)     f32  position embedding + conv bias; fetched once per tile
    # o:  (1, tP, Hd)  lane-dense output (hidden on lanes)
    acc = jnp.dot(p_ref[0], w_ref[...], preferred_element_type=jnp.float32)
    o_ref[0] = (acc + pe_ref[...]).astype(o_ref.dtype)


# ---------------------------------------------------------------------------
# Wrapper
# ---------------------------------------------------------------------------
def _pick_patch_tile(n_patches: int, cap: int = 256) -> int:
    # Largest multiple-of-8 divisor of n_patches up to `cap`; otherwise fall
    # back to the full extent (legal as a full-array block, e.g. n_patches=196).
    for t in (256, 128, 64, 32, 16, 8):
        if t <= cap and n_patches % t == 0:
            return t
    return n_patches


def _round_up(x: int, m: int) -> int:
    return (x + m - 1) // m * m


def embeddings_forward(x_nchw, params, patch_size):
    """Non-hybrid Embeddings.forward. Returns (embeddings, features=None)."""
    ph, pw = patch_size
    w_oihw, bias, pos = params["w"], params["b"], params["pos"]
    N, C, H, W = x_nchw.shape
    Hd = w_oihw.shape[0]
    Hp, Wp = H // ph, W // pw
    n_patches = Hp * Wp
    K = C * ph * pw

    # im2col patchify: stride == kernel => pure reshape/transpose.  Cast to
    # bf16 first so any materialized transpose moves half the bytes; K order
    # is (c, dh, dw) to match the PyTorch OIHW weight flattening.
    patches = x_nchw.astype(jnp.bfloat16).reshape(N, C, Hp, ph, Wp, pw)
    patches = jnp.transpose(patches, (0, 2, 4, 1, 3, 5)).reshape(N, n_patches, K)

    # Conv weight (OIHW) -> (K, Hd) bf16 for the MXU.
    w_mat = jnp.transpose(w_oihw.reshape(Hd, K), (1, 0)).astype(jnp.bfloat16)

    # Fold the conv bias into the position embedding (single f32 epilogue operand).
    pe = (pos.reshape(n_patches, Hd) + bias.reshape(1, Hd)).astype(jnp.float32)

    # Pad K to a lane multiple only when K is already large (padding a tiny K
    # would inflate the mem-bound patch stream for little MXU benefit).
    Kp = K
    if K > 128 and K % 128 != 0:
        Kp = _round_up(K, 128)
        patches = jnp.pad(patches, ((0, 0), (0, 0), (0, Kp - K)))
        w_mat = jnp.pad(w_mat, ((0, Kp - K), (0, 0)))

    tP = _pick_patch_tile(n_patches)
    p_tiles = n_patches // tP
    # Batch innermost => pos block index constant along the inner axis
    # (fetched once per patch tile, not once per batch element).
    grid = (p_tiles, N)

    out = pl.pallas_call(
        _patch_embed_kernel,
        out_shape=jax.ShapeDtypeStruct((N, n_patches, Hd), x_nchw.dtype),
        grid=grid,
        in_specs=[
            pl.BlockSpec((1, tP, Kp), lambda p, n: (n, p, 0)),
            pl.BlockSpec((Kp, Hd), lambda p, n: (0, 0)),
            pl.BlockSpec((tP, Hd), lambda p, n: (p, 0)),
        ],
        out_specs=pl.BlockSpec((1, tP, Hd), lambda p, n: (n, p, 0)),
        compiler_params=pltpu.CompilerParams(
            dimension_semantics=("parallel", "parallel"),
            allow_input_fusion=[True, False, False],
        ),
    )(patches, w_mat, pe)
    # Dropout: eval mode -> identity; features=None on the non-hybrid path.
    return out, None


# ---------------------------------------------------------------------------
# Pure-JAX reference (for correctness check)
# ---------------------------------------------------------------------------
def _ref_forward(x_nchw, params, patch_size):
    ph, pw = patch_size
    w_oihw, bias, pos = params["w"], params["b"], params["pos"]
    w_hwio = jnp.transpose(w_oihw, (2, 3, 1, 0))
    y = jax.lax.conv_general_dilated(
        x_nchw, w_hwio, window_strides=(ph, pw), padding="VALID",
        dimension_numbers=("NCHW", "HWIO", "NCHW"),
        precision=jax.lax.Precision.HIGHEST)
    y = y + bias[None, :, None, None]
    N, Hd, Hp, Wp = y.shape
    y = jnp.transpose(y.reshape(N, Hd, Hp * Wp), (0, 2, 1))   # flatten(2).transpose(-1,-2)
    return y + pos


# ---------------------------------------------------------------------------
# Main
# ---------------------------------------------------------------------------
if __name__ == "__main__":
    N, C = 2, 8
    H = W = 32
    patch = (4, 4)          # K = C*ph*pw = 128 (lane-dense contraction)
    hidden = 128            # lane-dense hidden size (real ViT uses 768)

    Hp, Wp = H // patch[0], W // patch[1]
    n_patches = Hp * Wp     # 64

    key = jax.random.PRNGKey(0)
    kx, kw, kb, kp = jax.random.split(key, 4)
    x = jax.random.normal(kx, (N, C, H, W), jnp.float32)      # NCHW, PyTorch layout
    params = {
        # PyTorch Conv2d weight is OIHW: (hidden, Cin, ph, pw)
        "w": 0.1 * jax.random.normal(kw, (hidden, C, patch[0], patch[1]), jnp.float32),
        "b": 0.1 * jax.random.normal(kb, (hidden,), jnp.float32),
        # nn.Parameter(zeros) in the module; random here so the add is non-trivial
        "pos": 0.1 * jax.random.normal(kp, (1, n_patches, hidden), jnp.float32),
    }

    fwd = jax.jit(embeddings_forward, static_argnums=2)
    out, feats = fwd(x, params, patch)
    out = jax.block_until_ready(out)

    ref = jax.block_until_ready(_ref_forward(x, params, patch))
    assert out.shape == (N, n_patches, hidden), out.shape
    assert feats is None
    # bf16 MXU operands -> slightly looser tolerance vs the f32 reference.
    np.testing.assert_allclose(np.asarray(out), np.asarray(ref), rtol=2e-2, atol=2e-2)

    print("KERNEL_OK")
</pallas_src>

<mosaic_0001>
module attributes {stable_mosaic.version = 11 : i64} {
  func.func @_patch_embed_kernel(%arg0: i32, %arg1: i32, %arg2: memref<1x64x128xbf16, #tpu.memory_space<vmem>>, %arg3: memref<128x128xbf16, #tpu.memory_space<vmem>>, %arg4: memref<64x128xf32, #tpu.memory_space<vmem>>, %arg5: memref<1x64x128xf32, #tpu.memory_space<vmem>>) attributes {dimension_semantics = [#tpu.dimension_semantics<parallel>, #tpu.dimension_semantics<parallel>], iteration_bounds = array<i64: 1, 2>, scalar_prefetch = 0 : i64, scratch_operands = 0 : i64, tpu.core_type = #tpu.core_type<tc>, window_params = [{transform_indices = @transform_0, window_bounds = array<i64: 1, 64, 128>}, {pipeline_mode = #tpu.pipeline_mode<synchronous>, transform_indices = @transform_1, window_bounds = array<i64: 128, 128>}, {transform_indices = @transform_2, window_bounds = array<i64: 64, 128>}, {transform_indices = @transform_3, window_bounds = array<i64: 1, 64, 128>}]} {
    %c0 = arith.constant 0 : index
    %c0_0 = arith.constant 0 : index
    %c0_1 = arith.constant 0 : index
    %0 = vector.load %arg2[%c0, %c0_0, %c0_1] : memref<1x64x128xbf16, #tpu.memory_space<vmem>>, vector<1x64x128xbf16>
    %1 = vector.shape_cast %0 : vector<1x64x128xbf16> to vector<64x128xbf16>
    %c0_2 = arith.constant 0 : index
    %c0_3 = arith.constant 0 : index
    %2 = vector.load %arg3[%c0_2, %c0_3] : memref<128x128xbf16, #tpu.memory_space<vmem>>, vector<128x128xbf16>
    %cst = arith.constant dense<0.000000e+00> : vector<64x128xf32>
    %3 = tpu.matmul %1, %2, %cst {dimension_numbers = #tpu.dot_dimension_numbers<[1], [0], [0], [1], [0, 0, 1, 1], [], []>} : vector<64x128xbf16>, vector<128x128xbf16>, vector<64x128xf32> -> vector<64x128xf32>
    %c0_4 = arith.constant 0 : index
    %c0_5 = arith.constant 0 : index
    %4 = vector.load %arg4[%c0_4, %c0_5] : memref<64x128xf32, #tpu.memory_space<vmem>>, vector<64x128xf32>
    %5 = arith.addf %3, %4 : vector<64x128xf32>
    %c0_6 = arith.constant 0 : index
    %c0_7 = arith.constant 0 : index
    %c0_8 = arith.constant 0 : index
    %6 = vector.load %arg5[%c0_6, %c0_7, %c0_8] : memref<1x64x128xf32, #tpu.memory_space<vmem>>, vector<1x64x128xf32>
    %7 = vector.shape_cast %6 : vector<1x64x128xf32> to vector<64x128xf32>
    %8 = vector.shape_cast %5 : vector<64x128xf32> to vector<1x64x128xf32>
    tpu.vector_store %arg5[%c0_6, %c0_7, %c0_8], %8 {strides = array<i32>} : memref<1x64x128xf32, #tpu.memory_space<vmem>>, vector<1x64x128xf32>,
    return
  }
  func.func @transform_0(%arg0: i32, %arg1: i32) -> (i32, i32, i32) {
    %c0_i32 = arith.constant 0 : i32
    %c0_i32_0 = arith.constant 0 : i32
    return %arg1, %arg0, %c0_i32 : i32, i32, i32
  }
  func.func @transform_1(%arg0: i32, %arg1: i32) -> (i32, i32) {
    %c0_i32 = arith.constant 0 : i32
    %c0_i32_0 = arith.constant 0 : i32
    %c0_i32_1 = arith.constant 0 : i32
    return %c0_i32, %c0_i32_0 : i32, i32
  }
  func.func @transform_2(%arg0: i32, %arg1: i32) -> (i32, i32) {
    %c0_i32 = arith.constant 0 : i32
    %c0_i32_0 = arith.constant 0 : i32
    return %arg0, %c0_i32 : i32, i32
  }
  func.func @transform_3(%arg0: i32, %arg1: i32) -> (i32, i32, i32) {
    %c0_i32 = arith.constant 0 : i32
    %c0_i32_0 = arith.constant 0 : i32
    return %arg1, %arg0, %c0_i32 : i32, i32, i32
  }
}

</mosaic_0001>

<bundles_post_ra>
// kernel: embeddings_forward.1
= control target key start
LH: loop header
LB: loop body
LE: loop exit
PB: predicated region body
PF: predicated region fallthrough
CT: control target
= control target key end

     0   :  { %8 = vsyncpa [#allocation3], 0  ;;  %s894_s0 = inlined_call_operand.vmem [shape: bf16[2,64,128], index: 0, kind: input, shape index: {}]   ;;  %s895_s1 = inlined_call_operand.vmem [shape: bf16[128,128], index: 1, kind: input, shape index: {}]   ;;  %s896_s2 = inlined_call_operand.vmem [shape: f32[64,128], index: 2, kind: input, shape index: {}]   ;;  %s897_s3 = inlined_call_operand.hbm [shape: f32[2,64,128], index: 3, kind: output, shape index: {}]  }
   0x1   :  { %10 = vsyncpa [#allocation3 + $0x1], 0  ;;  %s734_s12 = smov 0   ;;  %s736_s13 = smov 0  }
   0x2   :  { %s738_s14 = smov 0   ;;  %s740_s15 = smov 0  }
   0x3   :  { %s742_s16 = smov 0   ;;  %s744_s17 = smov 0  }
   0x4 LB: > { %s475_s18 = sadd.s32 4294967295, %s710_s17   ;;  %s476_s19 = sadd.s32 4294967294, %s710_s17   ;;  %s710_s17 = sphi %s744_s17, %s16_s17   ;;  %s706_s16 = sphi %s742_s16, %s904_s16   ;;  %s702_s15 = sphi %s740_s15, %s903_s15   ;;  %s698_s14 = sphi %s738_s14, %s902_s14   ;;  %s694_s13 = sphi %s736_s13, %s901_s13   ;;  %s690_s12 = sphi %s734_s12, %s900_s12  }
   0x5   : > { %s25_s20 = sadd.s32 1, %s706_s16  ;;  %s112_s21 = sadd.s32 1, %s698_s14 }
   0x6   : > { %p26_p0 = scmp.ge.s32.totalorder %s25_s20, 2  ;;  %p122_p1 = scmp.ne.s32.totalorder %s698_s14, %s694_s13 }
   0x7   : > { %p123_p2 = scmp.eq.s32.totalorder %s475_s18, 1  ;;  %p128_p3 = scmp.ne.s32.totalorder %s694_s13, %s690_s12 }
   0x8   : > { %s906_s20 = smov (%p26_p0, %s25_s20), 0  ;;  %p129_p5 = scmp.eq.s32.totalorder %s476_s19, 1 }
   0x9   : > { %p774_p4 = por %p123_p2, %p122_p1  ;;  %s107_s23 = ssub.s32 %s706_s16, %s906_s20 }
   0xa   : > { %p480_p6 = scmp.ge.s32.totalorder %s710_s17, 1  ;;  %p110_p7 = scmp.eq.s32.totalorder %s107_s23, 0 }
   0xb   : > { %p781_p8 = por %p129_p5, %p128_p3  ;;  %p172_p9 = scmp.lt.s32.totalorder %s710_s17, 3 }
   0xc   : > { %s787_s25 = scalar_select %p110_p7, %s698_s14, %s112_s21  }
   0xd   : > { %p173_p10 = pnand %p480_p6, %p172_p9 }
   0xe   : > { %p206_p11 = scmp.lt.s32.totalorder (!%p173_p10), %s702_s15, 1  ;;  %s202_s30 = sand.u32 (!%p173_p10), 1, %s694_s13  }
   0xf   : > { %176 = sbr.rel (%p173_p10) target bundleno = 200 (0xc8), region = 32  ;;  %s481_s4 = sshll.u32 (!%p173_p10), %s202_s30, 6 }
  0x10   : > { %s827_s9 = scalar_lea.vmem (!%p173_p10), [#allocation2], %s481_s4  ;;  %s550_s28 = sshll.u32 (!%p173_p10), %s702_s15, 6 }
  0x11   : > { %s377_s5 = scalar_lea.hbm (!%p173_p10), %s897_s3, %s550_s28  ;;  %s378_s10 = sshll.u32 (!%p173_p10), %s827_s9, 4  ;;  %s379_s10 = int_to_ptr.vmem [resolvable:$true] %s378_s10 }
  0x12   : > { %s364_s18 = scalar_lea.sflag (!%p173_p10), [#allocation3], %s202_s30  ;;  %s652_s27 = scalar_lea.hbm (!%p173_p10), %s897_s3, 128 }
  0x14   : > { %v549_v0 = vld [vmem:[%s895_s1 + $0x38] sm:$0xff]  ;;  %v548_v1 = vld [vmem:[%s895_s1 + $0x30] sm:$0xff]  ;;  %v547_v2 = vld [vmem:[%s895_s1 + $0x28] sm:$0xff]  ;;  %s207_s11 = scalar_select %p206_p11, %s702_s15, 1 }
  0x15   : > { %326 = vmatpush.bf16.msra.mxu0 %v549_v0  ;;  %551 = vmatpush.bf16.msra.mxu1 %v549_v0  ;;  %v546_v3 = vld [vmem:[%s895_s1 + $0x20] sm:$0xff]  ;;  %v545_v4 = vld [vmem:[%s895_s1 + $0x18] sm:$0xff]  ;;  %v544_v5 = vld [vmem:[%s895_s1 + $0x10] sm:$0xff] }
  0x16   : > { %552 = vmatpush.bf16.msra.mxu2 %v549_v0  ;;  %553 = vmatpush.bf16.msra.mxu3 %v549_v0  ;;  %v543_v6 = vld [vmem:[%s895_s1 + $0x8] sm:$0xff]  ;;  %s537_s21 = sshll.u32 %s207_s11, 5  ;;  %v542_v7 = vld [vmem:[%s895_s1] sm:$0xff]  ;;  %v248_v13 = vld [vmem:[%s896_s2 + $0x10] sm:$0xff]  ;;  %s380_s11 = sshll.u32 %s377_s5, 4  ;;  %s381_s11 = int_to_ptr.hbm [resolvable:$true] %s380_s11 }
  0x17   : > { %s213_s29 = scalar_lea.vmem %s894_s0, %s537_s21  ;;  %v246_v12 = vld [vmem:[%s896_s2] sm:$0xff]  ;;  %v252_v19 = vld [vmem:[%s896_s2 + $0x30] sm:$0xff]  ;;  %v247_v20 = vld [vmem:[%s896_s2 + $0x8] sm:$0xff]  ;;  %s646_s19 = sshra.s32 %s381_s11, 4  ;;  %s647_s19 = int_to_ptr.hbm [resolvable:$true] %s646_s19 }
  0x18   : > { %v538_v8 = vld [vmem:[%s213_s29] sm:$0xff]  ;;  %v539_v9 = vld [vmem:[%s213_s29 + $0x8] sm:$0xff]  ;;  %v540_v10 = vld [vmem:[%s213_s29 + $0x10] sm:$0xff]  ;;  %s648_s21 = scalar_lea.hbm %s647_s19, 64  ;;  %p653_p1 = scmp.lt.s32.totalorder %s647_s19, %s897_s3 }
  0x19   : > { %327 = vmatpush.bf16.msra.mxu0 %v548_v1  ;;  %554 = vmatpush.bf16.msra.mxu1 %v548_v1  ;;  %v541_v11 = vld [vmem:[%s213_s29 + $0x18] sm:$0xff]  ;;  %v250_v18 = vld [vmem:[%s896_s2 + $0x20] sm:$0xff]  ;;  %v251_v30 = vld [vmem:[%s896_s2 + $0x28] sm:$0xff]  ;;  %p649_p12 = scmp.ne.s32.totalorder %s647_s19, %s648_s21  ;;  %p654_p2 = scmp.lt.s32.totalorder %s652_s27, %s648_s21 }
  0x1a   : > { %555 = vmatpush.bf16.msra.mxu2 %v548_v1  ;;  %556 = vmatpush.bf16.msra.mxu3 %v548_v1  ;;  %v249_v21 = vld [vmem:[%s896_s2 + $0x18] sm:$0xff] }
  0x1b   : > { %v253_v31 = vld [vmem:[%s896_s2 + $0x38] sm:$0xff]  ;;  %p650_p13 = pnand %p649_p12, %p774_p4  ;;  %p655_p3 = por %p654_p2, %p653_p1 }
  0x1d   : > { %328 = vmatpush.bf16.msra.mxu0 %v547_v2  ;;  %557 = vmatpush.bf16.msra.mxu1 %v547_v2  ;;  %p651_p0 = pneg %p650_p13 }
  0x1e   : > { %558 = vmatpush.bf16.msra.mxu2 %v547_v2  ;;  %559 = vmatpush.bf16.msra.mxu3 %v547_v2 }
  0x1f   : > { %p656_p5 = pnand %p655_p3, %p651_p0 }
  0x21   : > { %329 = vmatpush.bf16.msra.mxu0 %v546_v3  ;;  %560 = vmatpush.bf16.msra.mxu1 %v546_v3 }
  0x22   : > { %561 = vmatpush.bf16.msra.mxu2 %v546_v3  ;;  %562 = vmatpush.bf16.msra.mxu3 %v546_v3 }
  0x25   : > { %330 = vmatpush.bf16.msra.mxu0 %v545_v4  ;;  %563 = vmatpush.bf16.msra.mxu1 %v545_v4 }
  0x26   : > { %564 = vmatpush.bf16.msra.mxu2 %v545_v4  ;;  %565 = vmatpush.bf16.msra.mxu3 %v545_v4 }
  0x29   : > { %331 = vmatpush.bf16.msra.mxu0 %v544_v5  ;;  %566 = vmatpush.bf16.msra.mxu1 %v544_v5 }
  0x2a   : > { %567 = vmatpush.bf16.msra.mxu2 %v544_v5  ;;  %568 = vmatpush.bf16.msra.mxu3 %v544_v5 }
  0x2d   : > { %332 = vmatpush.bf16.msra.mxu0 %v543_v6  ;;  %569 = vmatpush.bf16.msra.mxu1 %v543_v6 }
  0x2e   : > { %570 = vmatpush.bf16.msra.mxu2 %v543_v6  ;;  %571 = vmatpush.bf16.msra.mxu3 %v543_v6 }
  0x31   : > { %333 = vmatpush.bf16.msra.mxu0 %v542_v7  ;;  %572 = vmatpush.bf16.msra.mxu1 %v542_v7 }
  0x32   : > { %573 = vmatpush.bf16.msra.mxu2 %v542_v7  ;;  %574 = vmatpush.bf16.msra.mxu3 %v542_v7 }
  0x34   : > { %334 = vmatmul.bf16.vlgmr.msra.gmra.mxu0 %v538_v8  ;;  %339 = vmatmul.bf16.vlgmr.msra.gmra.mxu1 %v539_v9 }
  0x35   : > { %344 = vmatmul.bf16.vlgmr.msra.gmra.mxu2 %v540_v10  ;;  %349 = vmatmul.bf16.vlgmr.msra.gmra.mxu3 %v541_v11 }
  0xb1   : > { %v335_v14 = vpop.f32.mrf.mxu0  ;;  %v340_v15 = vpop.f32.mrf.mxu1 }
  0xb2   : > { %v336_v16 = vadd.f32 %v335_v14, %v246_v12  ;;  %v341_v17 = vadd.f32 %v340_v15, %v248_v13 }
  0xb4   : > { %355 = vst [vmem:[%s827_s9] sm:$0xff] %v336_v16 }
  0xb5   : > { %357 = vst [vmem:[%s827_s9 + $0x10] sm:$0xff] %v341_v17 }
  0xb8   : > { %v345_v22 = vpop.f32.mrf.mxu2  ;;  %v350_v23 = vpop.f32.mrf.mxu3 }
  0xb9   : > { %v346_v24 = vadd.f32 %v345_v22, %v250_v18  ;;  %v351_v25 = vadd.f32 %v350_v23, %v252_v19  ;;  %v337_v26 = vpop.f32.mrf.mxu0  ;;  %v342_v27 = vpop.f32.mrf.mxu1 }
  0xba   : > { %v338_v28 = vadd.f32 %v337_v26, %v247_v20  ;;  %v343_v29 = vadd.f32 %v342_v27, %v249_v21 }
  0xbb   : > { %359 = vst [vmem:[%s827_s9 + $0x20] sm:$0xff] %v346_v24 }
  0xbc   : > { %361 = vst [vmem:[%s827_s9 + $0x30] sm:$0xff] %v351_v25 }
  0xbd   : > { %356 = vst [vmem:[%s827_s9 + $0x8] sm:$0xff] %v338_v28 }
  0xbe   : > { %358 = vst [vmem:[%s827_s9 + $0x18] sm:$0xff] %v343_v29 }
  0xc0   : > { %v347_v32 = vpop.f32.mrf.mxu2  ;;  %v352_v33 = vpop.f32.mrf.mxu3 }
  0xc1   : > { %v348_v34 = vadd.f32 %v347_v32, %v251_v30  ;;  %v353_v35 = vadd.f32 %v352_v33, %v253_v31 }
  0xc3   : > { %360 = vst [vmem:[%s827_s9 + $0x28] sm:$0xff] %v348_v34 }
  0xc4   : > { %362 = vst [vmem:[%s827_s9 + $0x38] sm:$0xff] %v353_v35 }
  0xc5   : > { %659 = shalt.err (!%p656_p5)
}
  0xc6   : > { %s712_s30 = smov 128   ;;  %s713_s9 = smov 8  }
  0xc7   : > { %575 = dma.vmem_to_hbm [thread:$0]  (%p774_p4), %s379_s10, 1024, %s381_s11, %s364_s18, %s712_s30, %s712_s30, %s713_s9  }
  0xc8 PF: > { %p581_p6 = scmp.ge.s32.totalorder %s710_s17, 2  ;;  %s395_s4 = sand.u32 1, %s690_s12  }
  0xc9   : > { %s396_s5 = scalar_lea.sflag [#allocation3], %s395_s4 }
  0xca   : > { %p578_p7 = pnand %p581_p6, %p781_p8 }
  0xcc   : > { %p579_p9 = pneg %p578_p7 }
  0xce   : > { %685 = dma.done.wait (%p579_p9), %s396_s5, 1024  }
  0xcf   : > { %687 = vsyncadd (%p579_p9), %s396_s5, 4294966272  ;;  %s16_s17 = sadd.s32 1, %s710_s17   ;;  %s900_s12 = smov %s694_s13 }
  0xd0   : > { %p13_p10 = scmp.ge.s32.totalorder %s16_s17, 4   ;;  %s901_s13 = smov %s698_s14 }
  0xd1   : > { %s902_s14 = smov %s787_s25  ;;  %s903_s15 = smov %s706_s16 }
  0xd2   : > { %s904_s16 = smov %s906_s20  ;;  %15 = sbr.rel (!%p13_p10) target bundleno = 4 (0x4), region = 70 }
  0xd7   :  { %402 = vsyncpa [#allocation3], 1 }
  0xd8   :  { %404 = vsyncpa [#allocation3 + $0x1], 1 }

</bundles_post_ra>
